<compile_context>
chip_gen: v7x
topology: tpu7x:2x2x1
jax: 0.10.0
libtpu: 0.0.40
codegen_flags: <defaults>
</compile_context>

<pallas_src>
import functools
import math

import jax
import jax.numpy as jnp
from jax import lax
from jax.experimental import pallas as pl
from jax.experimental.pallas import tpu as pltpu

EPS = 1e-5


# --------------------------------------------------------------------------------------
# Hardware-aware policy helpers.
# --------------------------------------------------------------------------------------
def _round_up(n, m):
    return ((n + m - 1) // m) * m


@functools.lru_cache(maxsize=None)
def _device_kind():
    try:
        return jax.devices()[0].device_kind.lower()
    except Exception:
        return ""


@functools.lru_cache(maxsize=None)
def _vmem_capacity_bytes():
    try:
        return int(pltpu.get_tpu_info().vmem_capacity_bytes)
    except Exception:
        kind = _device_kind()
        return (64 if "7" in kind else 128) * (1 << 20)


@functools.lru_cache(maxsize=None)
def _mxu_align():
    kind = _device_kind()
    # v2-v5: 128x128 MXU tiles; v6e/v7x: 256x256.
    if any(t in kind for t in ("v2", "v3", "v4", "v5")):
        return 128
    return 256


@functools.lru_cache(maxsize=None)
def _vmem_policy():
    """(tile budget bytes, vmem_limit_bytes) per generation."""
    cap = _vmem_capacity_bytes()
    if cap >= 100 * (1 << 20):            # v5e / v6e: 128 MiB physical VMEM
        return 88 * (1 << 20), 112 * (1 << 20)
    return 28 * (1 << 20), 48 * (1 << 20)  # v7x: 64 MiB per TensorCore


def _pick_row_tile(n_rows, bytes_per_row, *, align, max_tile, budget, mxu_round=None):
    """Largest aligned row tile fitting `budget`, never larger than the array."""
    if n_rows <= align:
        return max(1, n_rows)              # full-dim block (allowed even if < 8)
    tile = max_tile
    while tile > align and tile * bytes_per_row > budget:
        tile //= 2
    tile = max(align, min(tile, (n_rows // align) * align))
    if mxu_round is not None and tile >= mxu_round:
        tile = (tile // mxu_round) * mxu_round
    # Keep at least 2 row tiles on large inputs (v7x megacore: 2nd TC would idle).
    if n_rows >= 256 and tile >= n_rows:
        tile = max(align, min(tile, _round_up((n_rows + 1) // 2, align)))
    return tile


def _pick_fused_tiles(R, D, x_itemsize, w_itemsize, budget, mxu_align, row_pack):
    """(tile_r, tile_k) for the K-tiled fused path: tile_k divides D, prefer tile_r>=256."""
    k_align = mxu_align if D % mxu_align == 0 else (128 if D % 128 == 0 else D)
    if k_align == D:
        divisors = [D]
    else:
        divisors = [c for c in range(D, 0, -k_align) if D % c == 0]
    bytes_per_row = 4 * D * x_itemsize + 4 * D        # x(2buf) + out(2buf) + f32 acc
    param_bytes = 8 * D * x_itemsize                  # bias / gamma / beta buffers
    best = None
    for tk in divisors:                               # largest tk first
        rem = budget - 2 * tk * D * w_itemsize - param_bytes
        if rem < 8 * bytes_per_row:
            continue
        tr = min(512, rem // bytes_per_row)
        tr = max(8, (tr // 8) * 8)
        if best is None or tr > best[0]:
            best = (tr, tk)
        if tr >= 256:                                 # enough rows to keep the MXU busy
            break
    if best is None:
        best = (8, divisors[-1])
    tile_r, tile_k = best
    if R <= row_pack:
        return max(1, R), tile_k
    tile_r = max(row_pack, min(tile_r, (R // row_pack) * row_pack))
    if tile_r >= mxu_align:
        tile_r = (tile_r // mxu_align) * mxu_align
    if R >= 256 and tile_r >= R:
        tile_r = max(row_pack, min(tile_r, _round_up((R + 1) // 2, row_pack)))
    return tile_r, tile_k


# --------------------------------------------------------------------------------------
# Shared LayerNorm epilogue (f32 stats, two-pass centered variance).
# --------------------------------------------------------------------------------------
def _layernorm_f32(y, gamma_ref, beta_ref, out_dtype):
    mean = jnp.mean(y, axis=-1, keepdims=True)
    centered = y - mean
    var = jnp.mean(centered * centered, axis=-1, keepdims=True)
    norm = centered * lax.rsqrt(var + EPS)
    return (gamma_ref[...].astype(jnp.float32) * norm
            + beta_ref[...].astype(jnp.float32)).astype(out_dtype)


# --------------------------------------------------------------------------------------
# Path 2 kernel: residual + LayerNorm over precomputed y (arbitrary sublayer).
# --------------------------------------------------------------------------------------
def _resln_rows_kernel(x_ref, y_ref, gamma_ref, beta_ref, o_ref):
    # x_ref, y_ref, o_ref: (TILE_R, D); gamma_ref, beta_ref: (1, D)
    y = y_ref[...].astype(jnp.float32)
    ln = _layernorm_f32(y, gamma_ref, beta_ref, o_ref.dtype)
    o_ref[...] = x_ref[...] + ln


def residual_connection(x, sublayer_fn, gamma, beta, *, tile_r=None):
    """out = x + LayerNorm(sublayer_fn(x)); x: [..., D], arbitrary plain-JAX sublayer."""
    # TODO(synk): arbitrary nn.Module sublayers cannot be fused; they run here in JAX.
    y = sublayer_fn(x)
    *lead, D = x.shape
    R = math.prod(lead) if lead else 1

    x2 = x.reshape(R, D)
    y2 = y.reshape(R, D)
    gamma2 = gamma.reshape(1, D)
    beta2 = beta.reshape(1, D)

    budget, vmem_limit = _vmem_policy()
    itemsize = x.dtype.itemsize
    align = 8 * max(1, 4 // itemsize)               # 8 rows f32, 16 rows bf16
    if tile_r is None:
        # x / y / out double-buffered at native dtype + f32 in-kernel temporaries.
        bytes_per_row = 3 * 2 * D * itemsize + 2 * D * 4
        tile_r = _pick_row_tile(R, bytes_per_row, align=align, max_tile=1024,
                                budget=budget)

    cost = pl.CostEstimate(
        flops=8 * R * D,
        transcendentals=R,
        bytes_accessed=3 * R * D * itemsize + 2 * D * itemsize,
    )

    out2 = pl.pallas_call(
        _resln_rows_kernel,
        out_shape=jax.ShapeDtypeStruct((R, D), x.dtype),
        grid_spec=pltpu.PrefetchScalarGridSpec(
            num_scalar_prefetch=0,
            grid=(pl.cdiv(R, tile_r),),
            in_specs=[
                pl.BlockSpec((tile_r, D), lambda i: (i, 0)),   # x (residual)
                pl.BlockSpec((tile_r, D), lambda i: (i, 0)),   # y = sublayer(x)
                pl.BlockSpec((1, D), lambda i: (0, 0)),        # gamma (VMEM-resident)
                pl.BlockSpec((1, D), lambda i: (0, 0)),        # beta
            ],
            out_specs=pl.BlockSpec((tile_r, D), lambda i: (i, 0)),
        ),
        compiler_params=pltpu.CompilerParams(
            dimension_semantics=("parallel",),
            vmem_limit_bytes=vmem_limit,
        ),
        cost_estimate=cost,
    )(x2, y2, gamma2, beta2)
    return out2.reshape(*lead, D)


# --------------------------------------------------------------------------------------
# Path 1 kernels: fused Linear(D, D) + residual + LayerNorm.
# --------------------------------------------------------------------------------------
def _fused_resident_kernel(x_ref, w_ref, b_ref, gamma_ref, beta_ref, o_ref):
    # x_ref: (TILE_R, D) serves both as matmul LHS and as the residual.
    x = x_ref[...]
    y = jnp.dot(x, w_ref[...], preferred_element_type=jnp.float32)
    y = y + b_ref[...].astype(jnp.float32)
    ln = _layernorm_f32(y, gamma_ref, beta_ref, o_ref.dtype)
    o_ref[...] = x + ln


def _fused_ktiled_kernel(x_ref, w_ref, b_ref, gamma_ref, beta_ref, o_ref, acc_ref,
                         *, tile_k):
    # grid = (row_tiles, k_tiles); K (reduction) axis is last and "arbitrary".
    # x_ref is the full-width (TILE_R, D) block (constant across k -> fetched once);
    # the matmul LHS is an in-kernel, lane-aligned slice of it.
    k = pl.program_id(1)

    @pl.when(k == 0)
    def _():
        acc_ref[...] = jnp.zeros_like(acc_ref)

    k_off = pl.multiple_of(k * tile_k, tile_k)
    lhs = x_ref[:, pl.ds(k_off, tile_k)]
    acc_ref[...] += jnp.dot(lhs, w_ref[...], preferred_element_type=jnp.float32)

    @pl.when(k == pl.num_programs(1) - 1)
    def _():
        y = acc_ref[...] + b_ref[...].astype(jnp.float32)        # (TILE_R, D), f32
        ln = _layernorm_f32(y, gamma_ref, beta_ref, o_ref.dtype)
        o_ref[...] = x_ref[...] + ln


def residual_connection_fused_linear(x, w, b, gamma, beta, *, tile_r=None, tile_k=None):
    """out = x + LayerNorm(x @ w + b) with the Linear fused into the kernel (MXU)."""
    *lead, D = x.shape
    assert w.shape == (D, D), "residual connection needs a square (D, D) sublayer"
    R = math.prod(lead) if lead else 1

    x2 = x.reshape(R, D)
    b2 = b.reshape(1, D)
    gamma2 = gamma.reshape(1, D)
    beta2 = beta.reshape(1, D)

    budget, vmem_limit = _vmem_policy()
    itemsize = x.dtype.itemsize
    w_item = w.dtype.itemsize
    mxu_align = _mxu_align()
    row_pack = 8 * max(1, 4 // itemsize)

    w_resident = (tile_k is None and 2 * D * D * w_item <= budget // 3) or \
                 (tile_k is not None and tile_k >= D)

    if w_resident:
        if tile_r is None:
            fixed = 2 * D * D * w_item + 8 * D * itemsize        # W buffers + params
            bytes_per_row = 4 * D * itemsize + 12 * D            # x/out bufs + f32 temps
            tile_r = _pick_row_tile(R, bytes_per_row, align=row_pack, max_tile=1024,
                                    budget=max(budget - fixed, 1 << 20),
                                    mxu_round=mxu_align)
        cost = pl.CostEstimate(
            flops=2 * R * D * D + 10 * R * D,
            transcendentals=R,
            bytes_accessed=2 * R * D * itemsize + D * D * w_item + 3 * D * itemsize,
        )
        out2 = pl.pallas_call(
            _fused_resident_kernel,
            out_shape=jax.ShapeDtypeStruct((R, D), x.dtype),
            grid_spec=pltpu.PrefetchScalarGridSpec(
                num_scalar_prefetch=0,
                grid=(pl.cdiv(R, tile_r),),
                in_specs=[
                    pl.BlockSpec((tile_r, D), lambda i: (i, 0)),   # x: LHS + residual
                    pl.BlockSpec((D, D), lambda i: (0, 0)),        # W (VMEM-resident)
                    pl.BlockSpec((1, D), lambda i: (0, 0)),        # bias
                    pl.BlockSpec((1, D), lambda i: (0, 0)),        # gamma
                    pl.BlockSpec((1, D), lambda i: (0, 0)),        # beta
                ],
                out_specs=pl.BlockSpec((tile_r, D), lambda i: (i, 0)),
            ),
            compiler_params=pltpu.CompilerParams(
                dimension_semantics=("parallel",),
                vmem_limit_bytes=vmem_limit,
            ),
            cost_estimate=cost,
        )(x2, w, b2, gamma2, beta2)
    else:
        tr_auto, tk_auto = _pick_fused_tiles(R, D, itemsize, w_item, budget,
                                             mxu_align, row_pack)
        if tile_k is None:
            tile_k = tk_auto
        if tile_r is None:
            tile_r = tr_auto
        assert D % tile_k == 0, "tile_k must divide D"
        n_rt = pl.cdiv(R, tile_r)
        cost = pl.CostEstimate(
            flops=2 * R * D * D + 10 * R * D,
            transcendentals=R,
            # W is re-streamed once per row tile when not resident.
            bytes_accessed=2 * R * D * itemsize + n_rt * D * D * w_item + 3 * D * itemsize,
        )
        out2 = pl.pallas_call(
            functools.partial(_fused_ktiled_kernel, tile_k=tile_k),
            out_shape=jax.ShapeDtypeStruct((R, D), x.dtype),
            grid_spec=pltpu.PrefetchScalarGridSpec(
                num_scalar_prefetch=0,
                grid=(n_rt, D // tile_k),
                in_specs=[
                    pl.BlockSpec((tile_r, D), lambda i, k: (i, 0)),   # x once (LHS+res)
                    pl.BlockSpec((tile_k, D), lambda i, k: (k, 0)),   # W K-slice
                    pl.BlockSpec((1, D), lambda i, k: (0, 0)),        # bias
                    pl.BlockSpec((1, D), lambda i, k: (0, 0)),        # gamma
                    pl.BlockSpec((1, D), lambda i, k: (0, 0)),        # beta
                ],
                out_specs=pl.BlockSpec((tile_r, D), lambda i, k: (i, 0)),
                scratch_shapes=[pltpu.VMEM((tile_r, D), jnp.float32)],
            ),
            compiler_params=pltpu.CompilerParams(
                dimension_semantics=("parallel", "arbitrary"),
                vmem_limit_bytes=vmem_limit,
            ),
            cost_estimate=cost,
        )(x2, w, b2, gamma2, beta2)
    return out2.reshape(*lead, D)


if __name__ == "__main__":
    # Small demo shapes, but lane-dense (D a multiple of 128).
    B, S, D = 2, 8, 128
    key = jax.random.PRNGKey(0)
    kx, kw, kb, kg, kbt = jax.random.split(key, 5)

    x = jax.random.normal(kx, (B, S, D), dtype=jnp.float32)
    w = jax.random.normal(kw, (D, D), dtype=jnp.float32) / math.sqrt(D)
    bias = 0.1 * jax.random.normal(kb, (D,), dtype=jnp.float32)
    gamma = 1.0 + 0.1 * jax.random.normal(kg, (D,), dtype=jnp.float32)
    beta = 0.1 * jax.random.normal(kbt, (D,), dtype=jnp.float32)

    def ln_ref(y, g, bt):
        mean = jnp.mean(y, axis=-1, keepdims=True)
        var = jnp.mean((y - mean) ** 2, axis=-1, keepdims=True)
        return g * (y - mean) / jnp.sqrt(var + EPS) + bt

    # Path 1a: Linear sublayer, W VMEM-resident, fully fused on-chip.
    out_fused = residual_connection_fused_linear(x, w, bias, gamma, beta)
    jax.block_until_ready(out_fused)
    ref_fused = x + ln_ref(jnp.einsum("bsd,de->bse", x, w) + bias, gamma, beta)
    assert jnp.allclose(out_fused, ref_fused, atol=2e-4, rtol=2e-4), "fused (resident) mismatch"

    # Path 1b: force the K-tiled fused kernel (large-D code path, deduplicated x).
    D2 = 256
    k0, k1, k2, k3 = jax.random.split(key, 4)
    x_b = jax.random.normal(k0, (B, S, D2), dtype=jnp.float32)
    w_b = jax.random.normal(k1, (D2, D2), dtype=jnp.float32) / math.sqrt(D2)
    b_b = 0.1 * jax.random.normal(k2, (D2,), dtype=jnp.float32)
    g_b = 1.0 + 0.1 * jax.random.normal(k3, (D2,), dtype=jnp.float32)
    bt_b = jnp.zeros((D2,), dtype=jnp.float32)
    out_kt = residual_connection_fused_linear(x_b, w_b, b_b, g_b, bt_b, tile_k=128)
    jax.block_until_ready(out_kt)
    ref_kt = x_b + ln_ref(jnp.einsum("bsd,de->bse", x_b, w_b) + b_b, g_b, bt_b)
    assert jnp.allclose(out_kt, ref_kt, atol=2e-4, rtol=2e-4), "fused (K-tiled) mismatch"

    # Path 2: arbitrary sublayer (tanh MLP) in plain JAX; kernel fuses residual + LN.
    sublayer_fn = lambda t: jnp.tanh(jnp.einsum("bsd,de->bse", t, w) + bias)
    out_gen = residual_connection(x, sublayer_fn, gamma, beta)
    jax.block_until_ready(out_gen)
    ref_gen = x + ln_ref(sublayer_fn(x), gamma, beta)
    assert jnp.allclose(out_gen, ref_gen, atol=2e-4, rtol=2e-4), "generic mismatch"

    print("KERNEL_OK")
</pallas_src>

<mosaic_0001>
module attributes {stable_mosaic.version = 11 : i64} {
  func.func @_fused_resident_kernel(%arg0: i32, %arg1: memref<16x128xf32, #tpu.memory_space<vmem>>, %arg2: memref<128x128xf32, #tpu.memory_space<vmem>>, %arg3: memref<1x128xf32, #tpu.memory_space<vmem>>, %arg4: memref<1x128xf32, #tpu.memory_space<vmem>>, %arg5: memref<1x128xf32, #tpu.memory_space<vmem>>, %arg6: memref<16x128xf32, #tpu.memory_space<vmem>>) attributes {dimension_semantics = [#tpu.dimension_semantics<parallel>], iteration_bounds = array<i64: 1>, scalar_prefetch = 0 : i64, scratch_operands = 0 : i64, tpu.core_type = #tpu.core_type<tc>, window_params = [{transform_indices = @transform_0, window_bounds = array<i64: 16, 128>}, {pipeline_mode = #tpu.pipeline_mode<synchronous>, transform_indices = @transform_1, window_bounds = array<i64: 128, 128>}, {pipeline_mode = #tpu.pipeline_mode<synchronous>, transform_indices = @transform_2, window_bounds = array<i64: 1, 128>}, {pipeline_mode = #tpu.pipeline_mode<synchronous>, transform_indices = @transform_3, window_bounds = array<i64: 1, 128>}, {pipeline_mode = #tpu.pipeline_mode<synchronous>, transform_indices = @transform_4, window_bounds = array<i64: 1, 128>}, {transform_indices = @transform_5, window_bounds = array<i64: 16, 128>}]} {
    %c0 = arith.constant 0 : index
    %c0_0 = arith.constant 0 : index
    %0 = vector.load %arg1[%c0, %c0_0] : memref<16x128xf32, #tpu.memory_space<vmem>>, vector<16x128xf32>
    %c0_1 = arith.constant 0 : index
    %c0_2 = arith.constant 0 : index
    %1 = vector.load %arg2[%c0_1, %c0_2] : memref<128x128xf32, #tpu.memory_space<vmem>>, vector<128x128xf32>
    %cst = arith.constant dense<0.000000e+00> : vector<16x128xf32>
    %2 = tpu.matmul %0, %1, %cst {dimension_numbers = #tpu.dot_dimension_numbers<[1], [0], [0], [1], [0, 0, 1, 1], [], []>} : vector<16x128xf32>, vector<128x128xf32>, vector<16x128xf32> -> vector<16x128xf32>
    %c0_3 = arith.constant 0 : index
    %c0_4 = arith.constant 0 : index
    %3 = vector.load %arg3[%c0_3, %c0_4] : memref<1x128xf32, #tpu.memory_space<vmem>>, vector<1x128xf32>
    %4 = vector.broadcast %3 : vector<1x128xf32> to vector<16x128xf32>
    %5 = arith.addf %2, %4 : vector<16x128xf32>
    %cst_5 = arith.constant dense<0.000000e+00> : vector<16xf32>
    %6 = vector.multi_reduction <add>, %5, %cst_5 [1] : vector<16x128xf32> to vector<16xf32>
    %7 = vector.shape_cast %6 : vector<16xf32> to vector<16x1xf32>
    %cst_6 = arith.constant 1.280000e+02 : f32
    %8 = vector.broadcast %cst_6 : f32 to vector<16x1xf32>
    %9 = arith.divf %7, %8 : vector<16x1xf32>
    %10 = vector.broadcast %9 : vector<16x1xf32> to vector<16x128xf32>
    %11 = arith.subf %5, %10 : vector<16x128xf32>
    %12 = arith.mulf %11, %11 : vector<16x128xf32>
    %cst_7 = arith.constant dense<0.000000e+00> : vector<16xf32>
    %13 = vector.multi_reduction <add>, %12, %cst_7 [1] : vector<16x128xf32> to vector<16xf32>
    %14 = vector.shape_cast %13 : vector<16xf32> to vector<16x1xf32>
    %cst_8 = arith.constant 1.280000e+02 : f32
    %15 = vector.broadcast %cst_8 : f32 to vector<16x1xf32>
    %16 = arith.divf %14, %15 : vector<16x1xf32>
    %cst_9 = arith.constant 9.99999974E-6 : f32
    %17 = vector.broadcast %cst_9 : f32 to vector<16x1xf32>
    %18 = arith.addf %16, %17 : vector<16x1xf32>
    %19 = math.rsqrt %18 : vector<16x1xf32>
    %20 = vector.broadcast %19 : vector<16x1xf32> to vector<16x128xf32>
    %21 = arith.mulf %11, %20 : vector<16x128xf32>
    %c0_10 = arith.constant 0 : index
    %c0_11 = arith.constant 0 : index
    %22 = vector.load %arg4[%c0_10, %c0_11] : memref<1x128xf32, #tpu.memory_space<vmem>>, vector<1x128xf32>
    %23 = vector.broadcast %22 : vector<1x128xf32> to vector<16x128xf32>
    %24 = arith.mulf %23, %21 : vector<16x128xf32>
    %c0_12 = arith.constant 0 : index
    %c0_13 = arith.constant 0 : index
    %25 = vector.load %arg5[%c0_12, %c0_13] : memref<1x128xf32, #tpu.memory_space<vmem>>, vector<1x128xf32>
    %26 = vector.broadcast %25 : vector<1x128xf32> to vector<16x128xf32>
    %27 = arith.addf %24, %26 : vector<16x128xf32>
    %28 = arith.addf %0, %27 : vector<16x128xf32>
    %c0_14 = arith.constant 0 : index
    %c0_15 = arith.constant 0 : index
    %29 = vector.load %arg6[%c0_14, %c0_15] : memref<16x128xf32, #tpu.memory_space<vmem>>, vector<16x128xf32>
    tpu.vector_store %arg6[%c0_14, %c0_15], %28 {strides = array<i32>} : memref<16x128xf32, #tpu.memory_space<vmem>>, vector<16x128xf32>,
    return
  }
  func.func @transform_0(%arg0: i32) -> (i32, i32) {
    %c0_i32 = arith.constant 0 : i32
    %c0_i32_0 = arith.constant 0 : i32
    return %arg0, %c0_i32 : i32, i32
  }
  func.func @transform_1(%arg0: i32) -> (i32, i32) {
    %c0_i32 = arith.constant 0 : i32
    %c0_i32_0 = arith.constant 0 : i32
    %c0_i32_1 = arith.constant 0 : i32
    return %c0_i32, %c0_i32_0 : i32, i32
  }
  func.func @transform_2(%arg0: i32) -> (i32, i32) {
    %c0_i32 = arith.constant 0 : i32
    %c0_i32_0 = arith.constant 0 : i32
    %c0_i32_1 = arith.constant 0 : i32
    return %c0_i32, %c0_i32_0 : i32, i32
  }
  func.func @transform_3(%arg0: i32) -> (i32, i32) {
    %c0_i32 = arith.constant 0 : i32
    %c0_i32_0 = arith.constant 0 : i32
    %c0_i32_1 = arith.constant 0 : i32
    return %c0_i32, %c0_i32_0 : i32, i32
  }
  func.func @transform_4(%arg0: i32) -> (i32, i32) {
    %c0_i32 = arith.constant 0 : i32
    %c0_i32_0 = arith.constant 0 : i32
    %c0_i32_1 = arith.constant 0 : i32
    return %c0_i32, %c0_i32_0 : i32, i32
  }
  func.func @transform_5(%arg0: i32) -> (i32, i32) {
    %c0_i32 = arith.constant 0 : i32
    %c0_i32_0 = arith.constant 0 : i32
    return %arg0, %c0_i32 : i32, i32
  }
}

</mosaic_0001>

<bundles_post_ra>
// kernel: tpu_custom_call.1
= control target key start
LH: loop header
LB: loop body
LE: loop exit
PB: predicated region body
PF: predicated region fallthrough
CT: control target
= control target key end

     0   :  { %10 = vsyncpa [#allocation3], 0  ;;  %s618_s0 = inlined_call_operand.hbm [shape: f32[16,128], index: 0, kind: input, shape index: {}]   ;;  %s619_s1 = inlined_call_operand.hbm [shape: f32[128,128], index: 1, kind: input, shape index: {}]   ;;  %s620_s2 = inlined_call_operand.hbm [shape: f32[1,128], index: 2, kind: input, shape index: {}]   ;;  %s621_s3 = inlined_call_operand.hbm [shape: f32[1,128], index: 3, kind: input, shape index: {}]   ;;  %s622_s4 = inlined_call_operand.hbm [shape: f32[1,128], index: 4, kind: input, shape index: {}]   ;;  %s623_s5 = inlined_call_operand.hbm [shape: f32[16,128], index: 5, kind: output, shape index: {}]  }
   0x1   :  { %11 = vsyncpa [#allocation6], 0 }
   0x2   :  { %12 = vsyncpa [#allocation9], 0 }
   0x3   :  { %13 = vsyncpa [#allocation4], 0  ;;  %s487_s18 = smov [#allocation5]   ;;  %s488_s20 = smov [#allocation8]  }
   0x4   :  { %s31_s19 = sshll.u32 %s487_s18, 4  ;;  %s54_s21 = sshll.u32 %s488_s20, 4  ;;  %s32_s19 = int_to_ptr.vmem [resolvable:$true] %s31_s19  ;;  %s525_s21 = int_to_ptr.vmem [resolvable:$true] %s54_s21 }
   0x5   :  { %s347_s24 = scalar_lea.hbm %s619_s1, 2048 }
   0x6   :  { %p348_p0 = scmp.ne.s32.totalorder %s619_s1, %s347_s24  ;;  %p351_p1 = scmp.lt.u32.totalorder %s347_s24, %s619_s1 }
   0x8   :  { %p353_p2 = pnand %p351_p1, %p348_p0 }
   0xa   :  { %356 = shalt.err (!%p353_p2)
}
   0xb   :  { %s357_s29 = scalar_lea.vmem %s32_s19, 2048  ;;  %p362_p4 = scmp.lt.s32.totalorder %s32_s19, %s32_s19 }
   0xc   :  { %p358_p3 = scmp.ne.s32.totalorder %s32_s19, %s357_s29  ;;  %p363_p5 = scmp.lt.s32.totalorder %s357_s29, %s357_s29 }
   0xe   :  { %p364_p6 = por %p363_p5, %p362_p4 }
  0x10   :  { %p365_p7 = pnand %p364_p6, %p358_p3 }
  0x12   :  { %368 = shalt.err (!%p365_p7)
}
  0x13   :  { %s489_s30 = smov 128   ;;  %s490_s6 = smov 8  }
  0x14   :  { %37 = dma.hbm_to_vmem [thread:$0]  %s619_s1, 2048, %s32_s19, [#allocation6], %s489_s30, %s489_s30, %s490_s6  }
  0x15   :  { %s369_s11 = scalar_lea.hbm %s621_s3, 16 }
  0x16   :  { %p370_p8 = scmp.ne.s32.totalorder %s621_s3, %s369_s11  ;;  %p373_p9 = scmp.lt.u32.totalorder %s369_s11, %s621_s3 }
  0x18   :  { %p375_p10 = pnand %p373_p9, %p370_p8 }
  0x1a   :  { %378 = shalt.err (!%p375_p10)
}
  0x1b   :  { %s379_s16 = scalar_lea.vmem %s525_s21, 16  ;;  %s383_s1 = scalar_lea.vmem %s525_s21, 32 }
  0x1c   :  { %p380_p11 = scmp.ne.s32.totalorder %s525_s21, %s379_s16  ;;  %p384_p12 = scmp.lt.s32.totalorder %s525_s21, %s525_s21 }
  0x1d   :  { %p385_p13 = scmp.lt.s32.totalorder %s383_s1, %s379_s16 }
  0x1f   :  { %p386_p0 = por %p385_p13, %p384_p12 }
  0x21   :  { %p387_p1 = pnand %p386_p0, %p380_p11 }
  0x23   :  { %390 = shalt.err (!%p387_p1)
}
  0x24   :  { %57 = dma.hbm_to_vmem [thread:$0]  %s621_s3, 16, %s525_s21, [#allocation9]  }
  0x25   :  { %s491_s19 = smov [#allocation2]   ;;  %s492_s22 = smov [#allocation7]  }
  0x26   :  { %s19_s20 = sshll.u32 %s491_s19, 4  ;;  %s44_s23 = sshll.u32 %s492_s22, 4  ;;  %s20_s20 = int_to_ptr.vmem [resolvable:$true] %s19_s20  ;;  %s45_s23 = int_to_ptr.vmem [resolvable:$true] %s44_s23 }
  0x27   :  { %s391_s26 = scalar_lea.hbm %s618_s0, 256 }
  0x28   :  { %p392_p2 = scmp.ne.s32.totalorder %s618_s0, %s391_s26  ;;  %p395_p3 = scmp.lt.u32.totalorder %s391_s26, %s618_s0 }
  0x2a   :  { %p397_p4 = pnand %p395_p3, %p392_p2 }
  0x2c   :  { %400 = shalt.err (!%p397_p4)
}
  0x2d   :  { %s401_s3 = scalar_lea.vmem %s20_s20, 256  ;;  %p406_p6 = scmp.lt.s32.totalorder %s20_s20, %s20_s20 }
  0x2e   :  { %p402_p5 = scmp.ne.s32.totalorder %s20_s20, %s401_s3  ;;  %p407_p7 = scmp.lt.s32.totalorder %s401_s3, %s401_s3 }
  0x30   :  { %p408_p8 = por %p407_p7, %p406_p6 }
  0x32   :  { %p409_p9 = pnand %p408_p8, %p402_p5 }
  0x34   :  { %412 = shalt.err (!%p409_p9)
}
  0x35   :  { %25 = dma.hbm_to_vmem [thread:$0]  %s618_s0, 256, %s20_s20, [#allocation3], %s489_s30, %s489_s30, %s490_s6  }
  0x36   :  { %s413_s11 = scalar_lea.hbm %s620_s2, 16 }
  0x37   :  { %p414_p10 = scmp.ne.s32.totalorder %s620_s2, %s413_s11  ;;  %p417_p11 = scmp.lt.u32.totalorder %s413_s11, %s620_s2 }
  0x39   :  { %p419_p12 = pnand %p417_p11, %p414_p10 }
  0x3b   :  { %422 = shalt.err (!%p419_p12)
}
  0x3c   :  { %s423_s16 = scalar_lea.vmem %s45_s23, 16  ;;  %s427_s1 = scalar_lea.vmem %s45_s23, 32 }
  0x3d   :  { %p424_p13 = scmp.ne.s32.totalorder %s45_s23, %s423_s16  ;;  %p428_p0 = scmp.lt.s32.totalorder %s45_s23, %s45_s23 }
  0x3e   :  { %p429_p1 = scmp.lt.s32.totalorder %s427_s1, %s423_s16 }
  0x40   :  { %p430_p2 = por %p429_p1, %p428_p0 }
  0x42   :  { %p431_p3 = pnand %p430_p2, %p424_p13 }
  0x44   :  { %434 = shalt.err (!%p431_p3)
}
  0x45   :  { %47 = dma.hbm_to_vmem [thread:$0]  %s620_s2, 16, %s45_s23, [#allocation6]  }
  0x46   :  { %s493_s18 = smov [#allocation10]   ;;  %s435_s24 = scalar_lea.hbm %s622_s4, 16 }
  0x47   :  { %s64_s19 = sshll.u32 %s493_s18, 4  ;;  %p436_p4 = scmp.ne.s32.totalorder %s622_s4, %s435_s24  ;;  %s65_s19 = int_to_ptr.vmem [resolvable:$true] %s64_s19 }
  0x48   :  { %p439_p5 = scmp.lt.u32.totalorder %s435_s24, %s622_s4 }
  0x4a   :  { %p441_p6 = pnand %p439_p5, %p436_p4 }
  0x4c   :  { %444 = shalt.err (!%p441_p6)
}
  0x4d   :  { %s445_s29 = scalar_lea.vmem %s65_s19, 16  ;;  %s449_s2 = scalar_lea.vmem %s65_s19, 32 }
  0x4e   :  { %p446_p7 = scmp.ne.s32.totalorder %s65_s19, %s445_s29  ;;  %p450_p8 = scmp.lt.s32.totalorder %s65_s19, %s65_s19 }
  0x4f   :  { %p451_p9 = scmp.lt.s32.totalorder %s449_s2, %s445_s29 }
  0x51   :  { %p452_p10 = por %p451_p9, %p450_p8 }
  0x53   :  { %p453_p11 = pnand %p452_p10, %p446_p7 }
  0x55   :  { %456 = shalt.err (!%p453_p11)
}
  0x56   :  { %67 = dma.hbm_to_vmem [thread:$0]  %s622_s4, 16, %s65_s19, [#allocation9]  }
  0x57   :  { %479 = dma.done.wait [#allocation3], 256  }
  0x58   :  { %480 = vsyncadd [#allocation3], 4294967040 }
  0x59   :  { %481 = dma.done.wait [#allocation6], 2064  }
  0x5a   :  { %482 = vsyncadd [#allocation6], 4294965232 }
  0x5b   :  { %483 = dma.done.wait [#allocation9], 32  }
  0x5c   :  { %484 = vsyncadd [#allocation9], 4294967264  ;;  %v85_v0 = vld [vmem:[#allocation5] sm:$0xff]  ;;  %v86_v1 = vld [vmem:[#allocation5 + $0x8] sm:$0xff]  ;;  %s494_s4 = smov [#allocation11]  }
  0x5d   :  { %v87_v2 = vld [vmem:[#allocation5 + $0x10] sm:$0xff]  ;;  %v303_v3 = vpack.c.bf16 %v86_v1, %v85_v0  ;;  %v88_v4 = vld [vmem:[#allocation5 + $0x18] sm:$0xff]  ;;  %v89_v6 = vld [vmem:[#allocation5 + $0x20] sm:$0xff]  ;;  %s233_s3 = sshll.u32 %s494_s4, 4  ;;  %s234_s3 = int_to_ptr.vmem [resolvable:$true] %s233_s3 }
  0x5e   :  { %v307_v5 = vpack.c.bf16 %v88_v4, %v87_v2  ;;  %v90_v7 = vld [vmem:[#allocation5 + $0x28] sm:$0xff]  ;;  %v599_v9 = vld [vmem:[#allocation2] sm:$0xff]  ;;  %v92_v11 = vld [vmem:[#allocation5 + $0x38] sm:$0xff]  ;;  %s457_s21 = scalar_lea.vmem %s234_s3, 256  ;;  %p462_p13 = scmp.lt.s32.totalorder %s234_s3, %s234_s3 }
  0x5f   :  { %304 = vmatprep.subr.bf16.mxu0 %v303_v3  ;;  %v311_v8 = vpack.c.bf16 %v90_v7, %v89_v6  ;;  %v91_v10 = vld [vmem:[#allocation5 + $0x30] sm:$0xff]  ;;  %300 = vmatprep.mubr.f32.mxu0 %v599_v9  ;;  %v93_v13 = vld [vmem:[#allocation5 + $0x40] sm:$0xff]  ;;  %v94_v14 = vld [vmem:[#allocation5 + $0x48] sm:$0xff]  ;;  %p458_p12 = scmp.ne.s32.totalorder %s234_s3, %s457_s21  ;;  %p463_p0 = scmp.lt.s32.totalorder %s457_s21, %s457_s21 }
  0x60   :  { %306 = vmatpush3.bf16.msra.mxu0 %v303_v3  ;;  %v315_v12 = vpack.c.bf16 %v92_v11, %v91_v10  ;;  %v319_v15 = vpack.c.bf16 %v94_v14, %v93_v13  ;;  %v95_v16 = vld [vmem:[#allocation5 + $0x50] sm:$0xff]  ;;  %v96_v17 = vld [vmem:[#allocation5 + $0x58] sm:$0xff]  ;;  %v97_v19 = vld [vmem:[#allocation5 + $0x60] sm:$0xff] }
  0x61   :  { %308 = vmatprep.subr.bf16.mxu0 %v307_v5  ;;  %v323_v18 = vpack.c.bf16 %v96_v17, %v95_v16  ;;  %v98_v20 = vld [vmem:[#allocation5 + $0x68] sm:$0xff]  ;;  %v99_v22 = vld [vmem:[#allocation5 + $0x70] sm:$0xff]  ;;  %v100_v23 = vld [vmem:[#allocation5 + $0x78] sm:$0xff]  ;;  %p464_p1 = por %p463_p0, %p462_p13 }
  0x62   :  { %v327_v21 = vpack.c.bf16 %v98_v20, %v97_v19  ;;  %v331_v24 = vpack.c.bf16 %v100_v23, %v99_v22  ;;  %v84_v25 = vld [vmem:[#allocation2 + $0x8] sm:$0xff]  ;;  %v247_v26 = vld [vmem:[#allocation7] ss:$0 sm:$0xff]  ;;  %v248_v46 = vld [vmem:[#allocation8] ss:$0 sm:$0xff] }
  0x63   :  { %v249_v48 = vld [vmem:[#allocation10] ss:$0 sm:$0xff]  ;;  %p465_p2 = pnand %p464_p1, %p458_p12 }
  0x64   :  { %310 = vmatpush3.bf16.msra.mxu0 %v307_v5 }
  0x65   :  { %312 = vmatprep.subr.bf16.mxu0 %v311_v8 }
  0x68   :  { %314 = vmatpush3.bf16.msra.mxu0 %v311_v8 }
  0x69   :  { %316 = vmatprep.subr.bf16.mxu0 %v315_v12 }
  0x6c   :  { %318 = vmatpush3.bf16.msra.mxu0 %v315_v12 }
  0x6d   :  { %320 = vmatprep.subr.bf16.mxu0 %v319_v15 }
  0x70   :  { %322 = vmatpush3.bf16.msra.mxu0 %v319_v15 }
  0x71   :  { %324 = vmatprep.subr.bf16.mxu0 %v323_v18 }
  0x74   :  { %326 = vmatpush3.bf16.msra.mxu0 %v323_v18 }
  0x75   :  { %328 = vmatprep.subr.bf16.mxu0 %v327_v21 }
  0x78   :  { %330 = vmatpush3.bf16.msra.mxu0 %v327_v21 }
  0x79   :  { %332 = vmatprep.subr.bf16.mxu0 %v331_v24 }
  0x7c   :  { %334 = vmatpush3.bf16.msra.mxu0 %v331_v24 }
  0x7f   :  { %301 = vmatmul.mubr.f32.vlgmr.msra.gmra.mrb[0].mxu0 %v84_v25 }
 0x152   :  { %v302_v27 = vpop.f32.mrb[0].mxu0 }
 0x153   :  { %v174_v28 = vpop.f32.mrb[1].mxu0  ;;  %v180_v30 = vadd.f32 %v302_v27, %v247_v26 }
 0x154   :  { %v175_v29 = vadd.f32 %v247_v26, %v174_v28 }
 0x156   :  { %183 = vadd.xlane.f32.xlu0 %v175_v29 }
 0x15a   :  { %185 = vadd.xlane.f32.xlu0 %v180_v30 }
 0x1e3   :  { %v184_v31 = vpop.xlane.xlu0 %183 }
 0x1e4   :  { %v188_v32 = vmul.f32 0.0078125, %v184_v31 }
 0x1e6   :  { %v190_v33 = vsub.f32 %v175_v29, %v188_v32 }
 0x1e7   :  { %v186_v34 = vpop.xlane.xlu0 %185 }
 0x1e8   :  { %v189_v35 = vmul.f32 0.0078125, %v186_v34  ;;  %v192_v36 = vmul.f32 %v190_v33, %v190_v33 }
 0x1ea   :  { %v191_v37 = vsub.f32 %v180_v30, %v189_v35  ;;  %194 = vadd.xlane.f32.xlu1 %v192_v36 }
 0x1ec   :  { %v193_v38 = vmul.f32 %v191_v37, %v191_v37 }
 0x1ee   :  { %196 = vadd.xlane.f32.xlu1 %v193_v38 }
 0x277   :  { %v195_v39 = vpop.xlane.xlu1 %194 }
 0x278   :  { %v198_v40 = vmul.f32 0.0078125, %v195_v39 }
 0x27a   :  { %v200_v41 = vadd.f32 1e-05, %v198_v40 }
 0x27b   :  { %v197_v42 = vpop.xlane.xlu1 %196 }
 0x27c   :  { %343 = vrsqrt.f32 %v200_v41  ;;  %v199_v43 = vmul.f32 0.0078125, %v197_v42 }
 0x27e   :  { %v201_v44 = vadd.f32 1e-05, %v199_v43 }
 0x280   :  { %345 = vrsqrt.f32 %v201_v44 }
 0x286   :  { %v344_v45 = vpop.eup %343 }
 0x287   :  { %v204_v47 = vmul.f32 %v344_v45, %v190_v33 }
 0x289   :  { %v213_v49 = vmul.f32 %v248_v46, %v204_v47 }
 0x28a   :  { %v346_v50 = vpop.eup %345 }
 0x28b   :  { %v205_v51 = vmul.f32 %v346_v50, %v191_v37  ;;  %v222_v52 = vadd.f32 %v249_v48, %v213_v49 }
 0x28d   :  { %v214_v53 = vmul.f32 %v248_v46, %v205_v51  ;;  %v224_v54 = vadd.f32 %v222_v52, %v599_v9 }
 0x28f   :  { %v223_v55 = vadd.f32 %v249_v48, %v214_v53  ;;  %226 = vst [vmem:[#allocation11] sm:$0xff] %v224_v54 }
 0x291   :  { %v225_v56 = vadd.f32 %v223_v55, %v84_v25 }
 0x293   :  { %227 = vst [vmem:[#allocation11 + $0x8] sm:$0xff] %v225_v56 }
 0x294   :  { %468 = shalt.err (!%p465_p2)
}
 0x295   :  { %s469_s10 = scalar_lea.hbm %s623_s5, 256 }
 0x296   :  { %p470_p3 = scmp.ne.s32.totalorder %s623_s5, %s469_s10  ;;  %p473_p4 = scmp.lt.u32.totalorder %s469_s10, %s623_s5 }
 0x298   :  { %p475_p5 = pnand %p473_p4, %p470_p3 }
 0x29a   :  { %478 = shalt.err (!%p475_p5)
}
 0x29b   :  { %239 = dma.vmem_to_hbm [thread:$0]  %s234_s3, 256, %s623_s5, [#allocation4], %s489_s30, %s489_s30, %s490_s6  }
 0x29c   :  { %485 = dma.done.wait [#allocation4], 256  }
 0x29d   :  { %486 = vsyncadd [#allocation4], 4294967040 }
 0x29e   :  { %243 = vsyncpa [#allocation3], 1 }
 0x29f   :  { %244 = vsyncpa [#allocation6], 1 }
 0x2a0   :  { %245 = vsyncpa [#allocation9], 1 }
 0x2a1   :  { %246 = vsyncpa [#allocation4], 1 }

</bundles_post_ra>
